<compile_context>
chip_gen: v5e
topology: v5e:2x2
jax: 0.10.0
libtpu: 0.0.40
codegen_flags: <defaults>
</compile_context>

<pallas_src>
import jax
import jax.numpy as jnp
from jax.experimental import pallas as pl
from jax.experimental.pallas import tpu as pltpu


# ------------------------------ tiling helpers ------------------------------

def _pick_tile(batch, d):
    """Rows per grid step.

    Large tiles (>=512 rows) keep DMAs near the HBM roofline and amortize the
    per-step overhead; requiring >=2 grid steps whenever the batch allows keeps
    both of v7x's TensorCores busy under dimension_semantics=("parallel",).
    The cap bounds the streamed f32 block to ~8 MiB so double-buffering stays
    comfortably inside v7x's 64 MiB VMEM for any embed_dim.
    """
    if batch <= 256:
        return batch                               # one full-extent block
    cap = max(512, min(4096, ((8 << 20) // (4 * d)) // 128 * 128))
    for t in (4096, 2048, 1024, 512, 256, 128):
        if t <= cap and batch >= 2 * t:
            return t
    return 128


def _vmem_budget(tb, d, k):
    """Explicit VMEM budget from the actual tile footprint (double-buffered
    streamed blocks + slack for in-kernel bf16 copies / intermediates)."""
    stream = 2 * tb * (d + 2 * k + 1) * 4          # embeds, targets, scores, sqerr
    return int(max(16 << 20, min(4 * stream, 48 << 20)))


# --------------------------------- kernels ----------------------------------

def _loss_kernel(x_ref, w1_ref, b1_ref, w2_ref, b2_ref, t_ref, sqerr_ref):
    # Layer 1: single bf16 MXU pass, f32 accumulate.  The f32->bf16 cast happens
    # here on the VPU (free under slack) instead of as a separate XLA dispatch.
    x = x_ref[...].astype(jnp.bfloat16)                       # [tb, D]
    h = jnp.dot(x, w1_ref[...], preferred_element_type=jnp.float32)
    h = jnp.maximum(h + b1_ref[...], 0.0)                     # bias/ReLU in f32
    # Layer 2: tiny (H x K), single bf16 MXU pass.
    s = jnp.dot(h.astype(jnp.bfloat16), w2_ref[...],
                preferred_element_type=jnp.float32) + b2_ref[...]   # [tb, K]
    diff = s - t_ref[...]
    sqerr_ref[...] = jnp.sum(diff * diff, axis=1, keepdims=True)    # [tb, 1]


def _pred_kernel(x_ref, w1_ref, b1_ref, w2_ref, b2_ref, s_ref):
    x = x_ref[...].astype(jnp.bfloat16)
    h = jnp.dot(x, w1_ref[...], preferred_element_type=jnp.float32)
    h = jnp.maximum(h + b1_ref[...], 0.0)
    s_ref[...] = jnp.dot(h.astype(jnp.bfloat16), w2_ref[...],
                         preferred_element_type=jnp.float32) + b2_ref[...]


# --------------------------------- wrappers ---------------------------------

@jax.jit
def _guaca_loss(embeds, targets, w1, b1, w2, b2):
    B, D = embeds.shape
    H = w1.shape[1]
    K = w2.shape[1]
    tb = _pick_tile(B, D)
    grid = (pl.cdiv(B, tb),)                       # ragged tail handled by masking

    sqerr = pl.pallas_call(
        _loss_kernel,
        grid=grid,
        in_specs=[
            pl.BlockSpec((tb, D), lambda i: (i, 0)),   # embeds   (streamed, f32)
            pl.BlockSpec((D, H), lambda i: (0, 0)),    # w1 bf16  (VMEM-resident)
            pl.BlockSpec((1, H), lambda i: (0, 0)),    # b1 f32
            pl.BlockSpec((H, K), lambda i: (0, 0)),    # w2 bf16
            pl.BlockSpec((1, K), lambda i: (0, 0)),    # b2 f32
            pl.BlockSpec((tb, K), lambda i: (i, 0)),   # targets  (streamed)
        ],
        out_specs=pl.BlockSpec((tb, 1), lambda i: (i, 0)),   # per-sample sq-err
        out_shape=jax.ShapeDtypeStruct((B, 1), jnp.float32),
        compiler_params=pltpu.CompilerParams(
            dimension_semantics=("parallel",),      # batch axis shardable on v7x
            vmem_limit_bytes=_vmem_budget(tb, D, K)),
    )(embeds, w1, b1, w2, b2, targets)

    return jnp.sum(sqerr) / (B * K)                # sum-then-divide: tiling-exact


@jax.jit
def _guaca_predict(embeds, w1, b1, w2, b2):
    B, D = embeds.shape
    H = w1.shape[1]
    K = w2.shape[1]
    tb = _pick_tile(B, D)
    grid = (pl.cdiv(B, tb),)

    return pl.pallas_call(
        _pred_kernel,
        grid=grid,
        in_specs=[
            pl.BlockSpec((tb, D), lambda i: (i, 0)),
            pl.BlockSpec((D, H), lambda i: (0, 0)),
            pl.BlockSpec((1, H), lambda i: (0, 0)),
            pl.BlockSpec((H, K), lambda i: (0, 0)),
            pl.BlockSpec((1, K), lambda i: (0, 0)),
        ],
        out_specs=pl.BlockSpec((tb, K), lambda i: (i, 0)),   # natural [B, K] scores
        out_shape=jax.ShapeDtypeStruct((B, K), jnp.float32),
        compiler_params=pltpu.CompilerParams(
            dimension_semantics=("parallel",),
            vmem_limit_bytes=_vmem_budget(tb, D, K)),
    )(embeds, w1, b1, w2, b2)


class GuacaPredictorPallas:
    """JAX/Pallas port of GuacaPredictor (forward = MSE loss, predict = scores)."""

    def __init__(self, embed_dim, n_funcs, key):
        hidden = embed_dim // 2
        k1, k2, k3, k4 = jax.random.split(key, 4)
        lim1 = 1.0 / jnp.sqrt(embed_dim)
        lim2 = 1.0 / jnp.sqrt(hidden)
        # f32 master parameters ([in, out] layout, PyTorch-Linear-like init).
        self.w1 = jax.random.uniform(k1, (embed_dim, hidden), jnp.float32, -lim1, lim1)
        self.b1 = jax.random.uniform(k2, (hidden,), jnp.float32, -lim1, lim1)
        self.w2 = jax.random.uniform(k3, (hidden, n_funcs), jnp.float32, -lim2, lim2)
        self.b2 = jax.random.uniform(k4, (n_funcs,), jnp.float32, -lim2, lim2)
        # Kernel-layout copies (weights bf16 for single-pass MXU; biases as rows).
        # Note: the bf16 weight/activation rounding is a small deviation from the
        # f32 PyTorch module (relative error ~1e-3); acceptable for this use.
        self.w1k = self.w1.astype(jnp.bfloat16)     # [D, H]
        self.b1k = self.b1.reshape(1, -1)           # [1, H]
        self.w2k = self.w2.astype(jnp.bfloat16)     # [H, K]
        self.b2k = self.b2.reshape(1, -1)           # [1, K]
        # TODO(synk): func2idx/func2name/get_func_key call external scoring
        # functions on SMILES strings (host-side); not representable in a TPU kernel.

    def forward(self, embeds, targets):
        # Loss-only path: scores are never materialized / written to HBM.
        return _guaca_loss(embeds, targets, self.w1k, self.b1k, self.w2k, self.b2k)

    def predict(self, embeds):
        squeeze = False
        if embeds.ndim == 1:
            embeds = embeds[None, :]
            squeeze = True
        scores = _guaca_predict(embeds, self.w1k, self.b1k, self.w2k, self.b2k)
        if squeeze:
            scores = scores[0]
        return scores


if __name__ == "__main__":
    key = jax.random.PRNGKey(0)
    k_emb, k_tgt, k_par = jax.random.split(key, 3)

    B, D, K = 384, 32, 3                   # batch, embed_dim, num scoring funcs
    embeds = jax.random.normal(k_emb, (B, D), jnp.float32)
    targets = jax.random.uniform(k_tgt, (B, K), jnp.float32)

    model = GuacaPredictorPallas(embed_dim=D, n_funcs=K, key=k_par)

    loss = model.forward(embeds, targets)              # multi-step grid (tb=128)
    scores = model.predict(embeds)
    scores1 = model.predict(embeds[0])                 # 1-D (single molecule) path

    Br = 300                                           # ragged batch: cdiv grid +
    loss_r = model.forward(embeds[:Br], targets[:Br])  # masked tail block
    scores_r = model.predict(embeds[:Br])

    jax.block_until_ready((loss, scores, scores1, loss_r, scores_r))

    # Reference in plain JAX, mirroring the kernel's bf16 MXU inputs (f32 accumulate).
    hp = jax.lax.Precision.HIGHEST
    def ref_scores(x):
        xb = x.astype(jnp.bfloat16).astype(jnp.float32)
        w1b = model.w1.astype(jnp.bfloat16).astype(jnp.float32)
        h = jnp.maximum(jnp.dot(xb, w1b, precision=hp) + model.b1[None, :], 0.0)
        hb = h.astype(jnp.bfloat16).astype(jnp.float32)
        w2b = model.w2.astype(jnp.bfloat16).astype(jnp.float32)
        return jnp.dot(hb, w2b, precision=hp) + model.b2[None, :]

    s_ref = ref_scores(embeds)
    loss_ref = jnp.mean((s_ref - targets) ** 2)
    loss_ref_r = jnp.mean((s_ref[:Br] - targets[:Br]) ** 2)

    assert scores.shape == (B, K)
    assert scores1.shape == (K,)
    assert scores_r.shape == (Br, K)
    assert jnp.allclose(scores, s_ref, rtol=1e-2, atol=1e-2)
    assert jnp.allclose(scores1, s_ref[0], rtol=1e-2, atol=1e-2)
    assert jnp.allclose(scores_r, s_ref[:Br], rtol=1e-2, atol=1e-2)
    assert jnp.allclose(loss, loss_ref, rtol=1e-2, atol=1e-2)
    assert jnp.allclose(loss_r, loss_ref_r, rtol=1e-2, atol=1e-2)

    print("KERNEL_OK")
</pallas_src>

<mosaic_0001>
module attributes {stable_mosaic.version = 11 : i64} {
  func.func @_loss_kernel(%arg0: i32, %arg1: memref<128x32xf32, #tpu.memory_space<vmem>>, %arg2: memref<32x16xbf16, #tpu.memory_space<vmem>>, %arg3: memref<1x16xf32, #tpu.memory_space<vmem>>, %arg4: memref<16x3xbf16, #tpu.memory_space<vmem>>, %arg5: memref<1x3xf32, #tpu.memory_space<vmem>>, %arg6: memref<128x3xf32, #tpu.memory_space<vmem>>, %arg7: memref<128x1xf32, #tpu.memory_space<vmem>>) attributes {dimension_semantics = [#tpu.dimension_semantics<parallel>], iteration_bounds = array<i64: 3>, scalar_prefetch = 0 : i64, scratch_operands = 0 : i64, tpu.core_type = #tpu.core_type<tc>, window_params = [{transform_indices = @transform_0, window_bounds = array<i64: 128, 32>}, {pipeline_mode = #tpu.pipeline_mode<synchronous>, transform_indices = @transform_1, window_bounds = array<i64: 32, 16>}, {pipeline_mode = #tpu.pipeline_mode<synchronous>, transform_indices = @transform_2, window_bounds = array<i64: 1, 16>}, {pipeline_mode = #tpu.pipeline_mode<synchronous>, transform_indices = @transform_3, window_bounds = array<i64: 16, 3>}, {pipeline_mode = #tpu.pipeline_mode<synchronous>, transform_indices = @transform_4, window_bounds = array<i64: 1, 3>}, {transform_indices = @transform_5, window_bounds = array<i64: 128, 3>}, {transform_indices = @transform_6, window_bounds = array<i64: 128, 1>}]} {
    %c0 = arith.constant 0 : index
    %c0_0 = arith.constant 0 : index
    %0 = vector.load %arg1[%c0, %c0_0] : memref<128x32xf32, #tpu.memory_space<vmem>>, vector<128x32xf32>
    %1 = arith.truncf %0 : vector<128x32xf32> to vector<128x32xbf16>
    %c0_1 = arith.constant 0 : index
    %c0_2 = arith.constant 0 : index
    %2 = vector.load %arg2[%c0_1, %c0_2] : memref<32x16xbf16, #tpu.memory_space<vmem>>, vector<32x16xbf16>
    %cst = arith.constant dense<0.000000e+00> : vector<128x16xf32>
    %3 = tpu.matmul %1, %2, %cst {dimension_numbers = #tpu.dot_dimension_numbers<[1], [0], [0], [1], [0, 0, 1, 1], [], []>} : vector<128x32xbf16>, vector<32x16xbf16>, vector<128x16xf32> -> vector<128x16xf32>
    %c0_3 = arith.constant 0 : index
    %c0_4 = arith.constant 0 : index
    %4 = vector.load %arg3[%c0_3, %c0_4] : memref<1x16xf32, #tpu.memory_space<vmem>>, vector<1x16xf32>
    %5 = vector.broadcast %4 : vector<1x16xf32> to vector<128x16xf32>
    %6 = arith.addf %3, %5 : vector<128x16xf32>
    %cst_5 = arith.constant 0.000000e+00 : f32
    %7 = vector.broadcast %cst_5 : f32 to vector<128x16xf32>
    %8 = arith.maximumf %6, %7 : vector<128x16xf32>
    %9 = arith.truncf %8 : vector<128x16xf32> to vector<128x16xbf16>
    %c0_6 = arith.constant 0 : index
    %c0_7 = arith.constant 0 : index
    %10 = vector.load %arg4[%c0_6, %c0_7] : memref<16x3xbf16, #tpu.memory_space<vmem>>, vector<16x3xbf16>
    %cst_8 = arith.constant dense<0.000000e+00> : vector<128x3xf32>
    %11 = tpu.matmul %9, %10, %cst_8 {dimension_numbers = #tpu.dot_dimension_numbers<[1], [0], [0], [1], [0, 0, 1, 1], [], []>} : vector<128x16xbf16>, vector<16x3xbf16>, vector<128x3xf32> -> vector<128x3xf32>
    %c0_9 = arith.constant 0 : index
    %c0_10 = arith.constant 0 : index
    %12 = vector.load %arg5[%c0_9, %c0_10] : memref<1x3xf32, #tpu.memory_space<vmem>>, vector<1x3xf32>
    %13 = vector.broadcast %12 : vector<1x3xf32> to vector<128x3xf32>
    %14 = arith.addf %11, %13 : vector<128x3xf32>
    %c0_11 = arith.constant 0 : index
    %c0_12 = arith.constant 0 : index
    %15 = vector.load %arg6[%c0_11, %c0_12] : memref<128x3xf32, #tpu.memory_space<vmem>>, vector<128x3xf32>
    %16 = arith.subf %14, %15 : vector<128x3xf32>
    %17 = arith.mulf %16, %16 : vector<128x3xf32>
    %cst_13 = arith.constant dense<0.000000e+00> : vector<128xf32>
    %18 = vector.multi_reduction <add>, %17, %cst_13 [1] : vector<128x3xf32> to vector<128xf32>
    %19 = vector.shape_cast %18 : vector<128xf32> to vector<128x1xf32>
    %c0_14 = arith.constant 0 : index
    %c0_15 = arith.constant 0 : index
    %20 = vector.load %arg7[%c0_14, %c0_15] : memref<128x1xf32, #tpu.memory_space<vmem>>, vector<128x1xf32>
    tpu.vector_store %arg7[%c0_14, %c0_15], %19 {strides = array<i32>} : memref<128x1xf32, #tpu.memory_space<vmem>>, vector<128x1xf32>,
    return
  }
  func.func @transform_0(%arg0: i32) -> (i32, i32) {
    %c0_i32 = arith.constant 0 : i32
    %c0_i32_0 = arith.constant 0 : i32
    return %arg0, %c0_i32 : i32, i32
  }
  func.func @transform_1(%arg0: i32) -> (i32, i32) {
    %c0_i32 = arith.constant 0 : i32
    %c0_i32_0 = arith.constant 0 : i32
    %c0_i32_1 = arith.constant 0 : i32
    return %c0_i32, %c0_i32_0 : i32, i32
  }
  func.func @transform_2(%arg0: i32) -> (i32, i32) {
    %c0_i32 = arith.constant 0 : i32
    %c0_i32_0 = arith.constant 0 : i32
    %c0_i32_1 = arith.constant 0 : i32
    return %c0_i32, %c0_i32_0 : i32, i32
  }
  func.func @transform_3(%arg0: i32) -> (i32, i32) {
    %c0_i32 = arith.constant 0 : i32
    %c0_i32_0 = arith.constant 0 : i32
    %c0_i32_1 = arith.constant 0 : i32
    return %c0_i32, %c0_i32_0 : i32, i32
  }
  func.func @transform_4(%arg0: i32) -> (i32, i32) {
    %c0_i32 = arith.constant 0 : i32
    %c0_i32_0 = arith.constant 0 : i32
    %c0_i32_1 = arith.constant 0 : i32
    return %c0_i32, %c0_i32_0 : i32, i32
  }
  func.func @transform_5(%arg0: i32) -> (i32, i32) {
    %c0_i32 = arith.constant 0 : i32
    %c0_i32_0 = arith.constant 0 : i32
    return %arg0, %c0_i32 : i32, i32
  }
  func.func @transform_6(%arg0: i32) -> (i32, i32) {
    %c0_i32 = arith.constant 0 : i32
    %c0_i32_0 = arith.constant 0 : i32
    return %arg0, %c0_i32 : i32, i32
  }
}

</mosaic_0001>

<bundles_post_ra>
// kernel: _guaca_loss.1
= control target key start
LH: loop header
LB: loop body
LE: loop exit
PB: predicated region body
PF: predicated region fallthrough
CT: control target
= control target key end

     0   :  { %s788_s21 = smov 0   ;;  %s930_s0 = inlined_call_operand.vmem [shape: f32[384,32], index: 0, kind: input, shape index: {}]   ;;  %s931_s1 = inlined_call_operand.vmem [shape: bf16[32,16], index: 1, kind: input, shape index: {}]   ;;  %s932_s2 = inlined_call_operand.vmem [shape: f32[1,16], index: 2, kind: input, shape index: {}]   ;;  %s933_s3 = inlined_call_operand.vmem [shape: bf16[16,3], index: 3, kind: input, shape index: {}]   ;;  %s934_s4 = inlined_call_operand.vmem [shape: f32[1,3], index: 4, kind: input, shape index: {}]   ;;  %s935_s5 = inlined_call_operand.vmem [shape: f32[384,3], index: 5, kind: input, shape index: {}]   ;;  %s936_s6 = inlined_call_operand.vmem [shape: f32[384,1], index: 6, kind: output, shape index: {}]  }
   0x1 LB: > { %s688_s22 = sadd.s32 4294967295, %s751_s21   ;;  %p692_p0 = scmp.ge.s32.totalorder %s751_s21, 1  ;;  %s751_s21 = sphi %s788_s21, %s16_s21  }
   0x2   : > { %p224_p1 = scmp.lt.s32.totalorder %s751_s21, 4 }
   0x4   : > { %p225_p2 = pnand %p692_p0, %p224_p1 }
   0x5   : > { %s693_s25 = sshll.u32 (!%p225_p2), %s688_s22, 4 }
   0x6   : > { %228 = sbr.rel (%p225_p2) target bundleno = 489 (0x1e9), region = 44  ;;  %p260_p3 = scmp.lt.s32.totalorder (!%p225_p2), %s693_s25, 47 }
   0xb   : > { %v730_v0 = vld [vmem:[%s931_s1 + $0x8] sm:$0xff]  ;;  %v729_v1 = vld [vmem:[%s931_s1] sm:$0xff]  ;;  %s938_s25 = smov (!%p260_p3, %s693_s25), 47  ;;  %vm322_vm0 = vcmask 261120   ;;  %vm432_vm1 = vcmask 130048   ;;  %vm554_vm2 = vcmask 23552  }
   0xc   : > { %353 = vmatpush.bf16.msra.mxu0 %v730_v0  ;;  %732 = vmatpush.bf16.msra.mxu2 %v730_v0  ;;  %s802_s28 = sshll.u32 %s938_s25, 3  ;;  %v731_v26 = vld [vmem:[%s933_s3] sm:$0xff]  ;;  %vm603_vm3 = vcmask 7168  }
   0xd   : > { %s263_s7 = scalar_lea.vmem %s930_s0, %s802_s28  ;;  %464 = vmatpush.bf16.msra.mxu1 %v731_v26  ;;  %734 = vmatpush.bf16.msra.mxu3 %v731_v26  ;;  %v743_v28 = vld [vmem:[%s932_s2] ss:$0 sm:$0xff]  ;;  %s839_s16 = scalar_lea.vmem %s935_s5, %s802_s28 }
   0xe   : > { %v278_v2 = vld [vmem:[%s263_s7] sm:$0xff]  ;;  %v279_v3 = vld [vmem:[%s263_s7 + $0x8] sm:$0xff]  ;;  %v280_v8 = vld [vmem:[%s263_s7 + $0x10] sm:$0xff]  ;;  %s893_s19 = scalar_lea.vmem %s936_s6, %s802_s28 }
   0xf   : > { %v286_v4 = vld [vmem:[%s263_s7 + $0x40] sm:$0xff]  ;;  %v294_v5 = vpack.c.bf16 %v279_v3, %v278_v2  ;;  %v287_v6 = vld [vmem:[%s263_s7 + $0x48] sm:$0xff]  ;;  %v281_v9 = vld [vmem:[%s263_s7 + $0x18] sm:$0xff] }
  0x10   : > { %354 = vmatpush.bf16.msra.mxu0 %v729_v1  ;;  %733 = vmatpush.bf16.msra.mxu2 %v729_v1  ;;  %v298_v7 = vpack.c.bf16 %v287_v6, %v286_v4  ;;  %v288_v10 = vld [vmem:[%s263_s7 + $0x50] sm:$0xff]  ;;  %v289_v11 = vld [vmem:[%s263_s7 + $0x58] sm:$0xff]  ;;  %v295_v12 = vpack.c.bf16 %v281_v9, %v280_v8  ;;  %v282_v14 = vld [vmem:[%s263_s7 + $0x20] sm:$0xff] }
  0x11   : > { %v299_v13 = vpack.c.bf16 %v289_v11, %v288_v10  ;;  %v283_v15 = vld [vmem:[%s263_s7 + $0x28] sm:$0xff]  ;;  %v290_v16 = vld [vmem:[%s263_s7 + $0x60] sm:$0xff]  ;;  %v284_v20 = vld [vmem:[%s263_s7 + $0x30] sm:$0xff] }
  0x12   : > { %v291_v17 = vld [vmem:[%s263_s7 + $0x68] sm:$0xff]  ;;  %v296_v18 = vpack.c.bf16 %v283_v15, %v282_v14  ;;  %v285_v21 = vld [vmem:[%s263_s7 + $0x38] sm:$0xff]  ;;  %v292_v22 = vld [vmem:[%s263_s7 + $0x70] sm:$0xff] }
  0x13   : > { %707 = vmatmul.msk.bf16.vlgmr.msra.gmra.mxu0 %vm322_vm0, %v294_v5  ;;  %711 = vmatmul.msk.bf16.vlgmr.msra.gmra.mxu2 %vm322_vm0, %v298_v7  ;;  %v300_v19 = vpack.c.bf16 %v291_v17, %v290_v16  ;;  %v293_v23 = vld [vmem:[%s263_s7 + $0x78] sm:$0xff]  ;;  %v297_v24 = vpack.c.bf16 %v285_v21, %v284_v20  ;;  %v833_v20 = vld [vmem:[%s934_s4] ss:$0 sm:$0xff] }
  0x14   : > { %v301_v25 = vpack.c.bf16 %v293_v23, %v292_v22  ;;  %v506_v22 = vld [vmem:[%s839_s16] sm:$0xff] }
  0x23   : > { %708 = vmatmul.msk.bf16.gmra.mxu0 %vm322_vm0, %v295_v12  ;;  %712 = vmatmul.msk.bf16.gmra.mxu2 %vm322_vm0, %v299_v13 }
  0x33   : > { %709 = vmatmul.msk.bf16.gmra.mxu0 %vm322_vm0, %v296_v18  ;;  %713 = vmatmul.msk.bf16.gmra.mxu2 %vm322_vm0, %v300_v19 }
  0x43   : > { %710 = vmatmul.msk.bf16.gmra.mxu0 %vm322_vm0, %v297_v24  ;;  %714 = vmatmul.msk.bf16.gmra.mxu2 %vm322_vm0, %v301_v25 }
  0x90   : > { %v356_v27 = vpop.f32.mrf.mxu0 }
  0x91   : > { %v357_v29 = vadd.f32 %v743_v28, %v356_v27 }
  0x93   : > { %v396_v34 = vmax.f32 %v357_v29, 0.0 }
  0x96   : > { %v376_v30 = vpop.f32.mrf.mxu2 }
  0x97   : > { %v377_v31 = vadd.f32 %v743_v28, %v376_v30 }
  0x98   : > { %v358_v32 = vpop.f32.mrf.mxu0 }
  0x99   : > { %v359_v33 = vadd.f32 %v743_v28, %v358_v32  ;;  %v404_v38 = vmax.f32 %v377_v31, 0.0 }
  0x9b   : > { %v397_v35 = vmax.f32 %v359_v33, 0.0 }
  0x9d   : > { %v412_v36 = vpack.c.bf16 %v397_v35, %v396_v34  ;;  %v508_v34 = vld [vmem:[%s839_s16 + $0x10] sm:$0xff] }
  0x9e   : > { %v378_v37 = vpop.f32.mrf.mxu2 }
  0x9f   : > { %719 = vmatmul.msk.bf16.vlgmr.msra.gmra.mxu1 %vm432_vm1, %v412_v36  ;;  %v379_v39 = vadd.f32 %v743_v28, %v378_v37 }
  0xa0   : > { %v361_v40 = vpop.f32.mrf.mxu0 }
  0xa1   : > { %v405_v41 = vmax.f32 %v379_v39, 0.0  ;;  %v362_v43 = vadd.f32 %v743_v28, %v361_v40  ;;  %v509_v40 = vld [vmem:[%s839_s16 + $0x18] sm:$0xff] }
  0xa3   : > { %v416_v42 = vpack.c.bf16 %v405_v41, %v404_v38  ;;  %v398_v47 = vmax.f32 %v362_v43, 0.0 }
  0xa6   : > { %v381_v44 = vpop.f32.mrf.mxu2 }
  0xa7   : > { %v382_v49 = vadd.f32 %v743_v28, %v381_v44  ;;  %v516_v44 = vld [vmem:[%s839_s16 + $0x50] sm:$0xff] }
  0xa8   : > { %v363_v45 = vpop.f32.mrf.mxu0 }
  0xa9   : > { %v364_v46 = vadd.f32 %v743_v28, %v363_v45  ;;  %v406_v52 = vmax.f32 %v382_v49, 0.0 }
  0xab   : > { %v399_v48 = vmax.f32 %v364_v46, 0.0 }
  0xad   : > { %v413_v50 = vpack.c.bf16 %v399_v48, %v398_v47 }
  0xae   : > { %v383_v51 = vpop.f32.mrf.mxu2 }
  0xaf   : > { %720 = vmatmul.msk.bf16.gmra.mxu1 %vm432_vm1, %v413_v50  ;;  %v384_v53 = vadd.f32 %v743_v28, %v383_v51  ;;  %v510_v50 = vld [vmem:[%s839_s16 + $0x20] sm:$0xff] }
  0xb0   : > { %v366_v54 = vpop.f32.mrf.mxu0 }
  0xb1   : > { %v407_v55 = vmax.f32 %v384_v53, 0.0  ;;  %v367_v57 = vadd.f32 %v743_v28, %v366_v54 }
  0xb3   : > { %v417_v56 = vpack.c.bf16 %v407_v55, %v406_v52  ;;  %v400_v61 = vmax.f32 %v367_v57, 0.0  ;;  %v517_v55 = vld [vmem:[%s839_s16 + $0x58] sm:$0xff] }
  0xb5   : > { %724 = vmatmul.msk.bf16.vlgmr.msra.gmra.mxu3 %vm432_vm1, %v417_v56 }
  0xb6   : > { %v386_v58 = vpop.f32.mrf.mxu2 }
  0xb7   : > { %v387_v63 = vadd.f32 %v743_v28, %v386_v58 }
  0xb8   : > { %v368_v59 = vpop.f32.mrf.mxu0 }
  0xb9   : > { %v369_v60 = vadd.f32 %v743_v28, %v368_v59  ;;  %v408_v2 = vmax.f32 %v387_v63, 0.0 }
  0xbb   : > { %v401_v62 = vmax.f32 %v369_v60, 0.0 }
  0xbd   : > { %v414_v0 = vpack.c.bf16 %v401_v62, %v400_v61 }
  0xbe   : > { %v388_v1 = vpop.f32.mrf.mxu2 }
  0xbf   : > { %721 = vmatmul.msk.bf16.gmra.mxu1 %vm432_vm1, %v414_v0  ;;  %v389_v3 = vadd.f32 %v743_v28, %v388_v1  ;;  %v511_v0 = vld [vmem:[%s839_s16 + $0x28] sm:$0xff] }
  0xc0   : > { %v371_v4 = vpop.f32.mrf.mxu0 }
  0xc1   : > { %v409_v5 = vmax.f32 %v389_v3, 0.0  ;;  %v372_v7 = vadd.f32 %v743_v28, %v371_v4 }
  0xc3   : > { %v418_v6 = vpack.c.bf16 %v409_v5, %v408_v2  ;;  %v402_v11 = vmax.f32 %v372_v7, 0.0  ;;  %v518_v2 = vld [vmem:[%s839_s16 + $0x60] sm:$0xff] }
  0xc5   : > { %725 = vmatmul.msk.bf16.gmra.mxu3 %vm432_vm1, %v418_v6 }
  0xc6   : > { %v391_v8 = vpop.f32.mrf.mxu2 }
  0xc7   : > { %v392_v13 = vadd.f32 %v743_v28, %v391_v8 }
  0xc8   : > { %v373_v9 = vpop.f32.mrf.mxu0 }
  0xc9   : > { %v374_v10 = vadd.f32 %v743_v28, %v373_v9  ;;  %v410_v16 = vmax.f32 %v392_v13, 0.0  ;;  %v512_v9 = vld [vmem:[%s839_s16 + $0x30] sm:$0xff] }
  0xcb   : > { %v403_v12 = vmax.f32 %v374_v10, 0.0 }
  0xcd   : > { %v415_v14 = vpack.c.bf16 %v403_v12, %v402_v11 }
  0xce   : > { %v393_v15 = vpop.f32.mrf.mxu2 }
  0xcf   : > { %722 = vmatmul.msk.bf16.gmra.mxu1 %vm432_vm1, %v415_v14  ;;  %v394_v17 = vadd.f32 %v743_v28, %v393_v15  ;;  %v507_v28 = vld [vmem:[%s839_s16 + $0x8] sm:$0xff] }
  0xd1   : > { %v411_v18 = vmax.f32 %v394_v17, 0.0  ;;  %v513_v17 = vld [vmem:[%s839_s16 + $0x38] sm:$0xff] }
  0xd3   : > { %v419_v19 = vpack.c.bf16 %v411_v18, %v410_v16 }
  0xd5   : > { %726 = vmatmul.msk.bf16.gmra.mxu3 %vm432_vm1, %v419_v19 }
  0xdf   : > { %723 = vmatmul.msk.bf16.gmra.mxu1 %vm432_vm1, %v416_v42 }
 0x11c   : > { %v466_v21 = vpop.f32.mrf.mxu1 }
 0x11d   : > { %v467_v23 = vadd.f32 %v833_v20, %v466_v21 }
 0x11f   : > { %v522_v24 = vsub.f32 %v467_v23, %v506_v22  ;;  %v519_v23 = vld [vmem:[%s839_s16 + $0x68] sm:$0xff] }
 0x121   : > { %v538_v25 = vmul.f32 %v522_v24, %v522_v24 }
 0x123   : > { %v555_v26 = vsel %vm554_vm2, %v538_v25, 0.0 }
 0x124   : > { %v468_v27 = vpop.f32.mrf.mxu1  ;;  %556 = vadd.xlane.f32.xlu0 %v555_v26 }
 0x125   : > { %v469_v29 = vadd.f32 %v833_v20, %v468_v27 }
 0x127   : > { %v523_v30 = vsub.f32 %v469_v29, %v507_v28 }
 0x129   : > { %v539_v31 = vmul.f32 %v523_v30, %v523_v30  ;;  %v514_v30 = vld [vmem:[%s839_s16 + $0x40] sm:$0xff] }
 0x12b   : > { %v558_v32 = vsel %vm554_vm2, %v539_v31, 0.0 }
 0x12c   : > { %v471_v33 = vpop.f32.mrf.mxu1  ;;  %559 = vadd.xlane.f32.xlu0 %v558_v32 }
 0x12d   : > { %v472_v35 = vadd.f32 %v833_v20, %v471_v33 }
 0x12f   : > { %v524_v36 = vsub.f32 %v472_v35, %v508_v34  ;;  %v520_v35 = vld [vmem:[%s839_s16 + $0x70] sm:$0xff] }
 0x131   : > { %v540_v37 = vmul.f32 %v524_v36, %v524_v36 }
 0x133   : > { %v561_v38 = vsel %vm554_vm2, %v540_v37, 0.0 }
 0x134   : > { %v473_v39 = vpop.f32.mrf.mxu1  ;;  %562 = vadd.xlane.f32.xlu1 %v561_v38 }
 0x135   : > { %v474_v41 = vadd.f32 %v833_v20, %v473_v39 }
 0x137   : > { %v525_v42 = vsub.f32 %v474_v41, %v509_v40 }
 0x138   : > { %v491_v43 = vpop.f32.mrf.mxu3 }
 0x139   : > { %v541_v45 = vmul.f32 %v525_v42, %v525_v42  ;;  %v492_v46 = vadd.f32 %v833_v20, %v491_v43  ;;  %v515_v42 = vld [vmem:[%s839_s16 + $0x48] sm:$0xff] }
 0x13b   : > { %v564_v47 = vsel %vm554_vm2, %v541_v45, 0.0  ;;  %v532_v48 = vsub.f32 %v492_v46, %v516_v44 }
 0x13c   : > { %v476_v49 = vpop.f32.mrf.mxu1  ;;  %565 = vadd.xlane.f32.xlu1 %v564_v47  ;;  %v521_v47 = vld [vmem:[%s839_s16 + $0x78] sm:$0xff] }
 0x13d   : > { %v477_v51 = vadd.f32 %v833_v20, %v476_v49  ;;  %v548_v52 = vmul.f32 %v532_v48, %v532_v48 }
 0x13f   : > { %v526_v53 = vsub.f32 %v477_v51, %v510_v50  ;;  %v585_v57 = vsel %vm554_vm2, %v548_v52, 0.0 }
 0x140   : > { %v493_v54 = vpop.f32.mrf.mxu3 }
 0x141   : > { %v542_v56 = vmul.f32 %v526_v53, %v526_v53  ;;  %v494_v58 = vadd.f32 %v833_v20, %v493_v54 }
 0x143   : > { %v567_v59 = vsel %vm554_vm2, %v542_v56, 0.0  ;;  %v533_v60 = vsub.f32 %v494_v58, %v517_v55 }
 0x144   : > { %v478_v61 = vpop.f32.mrf.mxu1  ;;  %568 = vadd.xlane.f32.xlu2 %v567_v59  ;;  %586 = vadd.xlane.f32.xlu1 %v585_v57 }
 0x145   : > { %v479_v62 = vadd.f32 %v833_v20, %v478_v61  ;;  %v549_v63 = vmul.f32 %v533_v60, %v533_v60 }
 0x147   : > { %v527_v4 = vsub.f32 %v479_v62, %v511_v0  ;;  %v588_v5 = vsel %vm554_vm2, %v549_v63, 0.0 }
 0x148   : > { %v496_v1 = vpop.f32.mrf.mxu3 }
 0x149   : > { %v497_v3 = vadd.f32 %v833_v20, %v496_v1  ;;  %v543_v11 = vmul.f32 %v527_v4, %v527_v4 }
 0x14b   : > { %v534_v6 = vsub.f32 %v497_v3, %v518_v2  ;;  %v570_v15 = vsel %vm554_vm2, %v543_v11, 0.0 }
 0x14c   : > { %v481_v7 = vpop.f32.mrf.mxu1  ;;  %589 = vadd.xlane.f32.xlu2 %v588_v5 }
 0x14d   : > { %v482_v8 = vadd.f32 %v833_v20, %v481_v7  ;;  %v550_v10 = vmul.f32 %v534_v6, %v534_v6 }
 0x14f   : > { %v528_v12 = vsub.f32 %v482_v8, %v512_v9  ;;  %v591_v13 = vsel %vm554_vm2, %v550_v10, 0.0 }
 0x150   : > { %v498_v14 = vpop.f32.mrf.mxu3  ;;  %592 = vadd.xlane.f32.xlu0 %v591_v13 }
 0x151   : > { %v544_v18 = vmul.f32 %v528_v12, %v528_v12  ;;  %v499_v21 = vadd.f32 %v833_v20, %v498_v14 }
 0x153   : > { %v573_v24 = vsel %vm554_vm2, %v544_v18, 0.0  ;;  %v535_v27 = vsub.f32 %v499_v21, %v519_v23 }
 0x154   : > { %v483_v16 = vpop.f32.mrf.mxu1  ;;  %571 = vadd.xlane.f32.xlu2 %v570_v15 }
 0x155   : > { %v484_v19 = vadd.f32 %v833_v20, %v483_v16  ;;  %v551_v34 = vmul.f32 %v535_v27, %v535_v27 }
 0x157   : > { %v529_v22 = vsub.f32 %v484_v19, %v513_v17  ;;  %v594_v39 = vsel %vm554_vm2, %v551_v34, 0.0 }
 0x158   : > { %574 = vadd.xlane.f32.xlu0 %v573_v24  ;;  %v501_v26 = vpop.f32.mrf.mxu3 }
 0x159   : > { %v545_v25 = vmul.f32 %v529_v22, %v529_v22  ;;  %v502_v32 = vadd.f32 %v833_v20, %v501_v26 }
 0x15b   : > { %v576_v28 = vsel %vm554_vm2, %v545_v25, 0.0  ;;  %v536_v37 = vsub.f32 %v502_v32, %v520_v35 }
 0x15c   : > { %v486_v29 = vpop.f32.mrf.mxu1  ;;  %577 = vadd.xlane.f32.xlu1 %v576_v28 }
 0x15d   : > { %v487_v31 = vadd.f32 %v833_v20, %v486_v29  ;;  %v552_v46 = vmul.f32 %v536_v37, %v536_v37 }
 0x15f   : > { %v530_v33 = vsub.f32 %v487_v31, %v514_v30  ;;  %v597_v50 = vsel %vm554_vm2, %v552_v46, 0.0 }
 0x160   : > { %v503_v40 = vpop.f32.mrf.mxu3 }
 0x161   : > { %v546_v36 = vmul.f32 %v530_v33, %v530_v33  ;;  %v504_v44 = vadd.f32 %v833_v20, %v503_v40 }
 0x163   : > { %v579_v38 = vsel %vm554_vm2, %v546_v36, 0.0  ;;  %v537_v49 = vsub.f32 %v504_v44, %v521_v47 }
 0x164   : > { %v488_v41 = vpop.f32.mrf.mxu1  ;;  %580 = vadd.xlane.f32.xlu2 %v579_v38  ;;  %595 = vadd.xlane.f32.xlu1 %v594_v39 }
 0x165   : > { %v489_v43 = vadd.f32 %v833_v20, %v488_v41  ;;  %v553_v52 = vmul.f32 %v537_v49, %v537_v49 }
 0x167   : > { %v531_v45 = vsub.f32 %v489_v43, %v515_v42  ;;  %v600_v53 = vsel %vm554_vm2, %v553_v52, 0.0 }
 0x169   : > { %v547_v48 = vmul.f32 %v531_v45, %v531_v45 }
 0x16b   : > { %v582_v51 = vsel %vm554_vm2, %v547_v48, 0.0 }
 0x16c   : > { %598 = vadd.xlane.f32.xlu2 %v597_v50  ;;  %583 = vadd.xlane.f32.xlu0 %v582_v51 }
 0x174   : > { %601 = vadd.xlane.f32.xlu0 %v600_v53 }
 0x197   : > { %v557_v20 = vpop.xlane.xlu0 %556 }
 0x198   : > { %604 = vst.msk [vmem:[%s893_s19] sm:$0xff] %vm603_vm3, %v557_v20 }
 0x19f   : > { %v560_v54 = vpop.xlane.xlu0 %559 }
 0x1a0   : > { %605 = vst.msk [vmem:[%s893_s19 + $0x8] sm:$0xff] %vm603_vm3, %v560_v54 }
 0x1a7   : > { %v563_v55 = vpop.xlane.xlu1 %562 }
 0x1a8   : > { %606 = vst.msk [vmem:[%s893_s19 + $0x10] sm:$0xff] %vm603_vm3, %v563_v55 }
 0x1af   : > { %v566_v56 = vpop.xlane.xlu1 %565 }
 0x1b0   : > { %607 = vst.msk [vmem:[%s893_s19 + $0x18] sm:$0xff] %vm603_vm3, %v566_v56 }
 0x1b7   : > { %v569_v57 = vpop.xlane.xlu2 %568  ;;  %v587_v58 = vpop.xlane.xlu1 %586 }
 0x1b8   : > { %608 = vst.msk [vmem:[%s893_s19 + $0x20] sm:$0xff] %vm603_vm3, %v569_v57 }
 0x1b9   : > { %614 = vst.msk [vmem:[%s893_s19 + $0x50] sm:$0xff] %vm603_vm3, %v587_v58 }
 0x1bf   : > { %v590_v59 = vpop.xlane.xlu2 %589 }
 0x1c0   : > { %615 = vst.msk [vmem:[%s893_s19 + $0x58] sm:$0xff] %vm603_vm3, %v590_v59 }
 0x1c3   : > { %v593_v60 = vpop.xlane.xlu0 %592 }
 0x1c4   : > { %616 = vst.msk [vmem:[%s893_s19 + $0x60] sm:$0xff] %vm603_vm3, %v593_v60 }
 0x1c7   : > { %v572_v61 = vpop.xlane.xlu2 %571 }
 0x1c8   : > { %609 = vst.msk [vmem:[%s893_s19 + $0x28] sm:$0xff] %vm603_vm3, %v572_v61 }
 0x1cb   : > { %v575_v62 = vpop.xlane.xlu0 %574 }
 0x1cc   : > { %610 = vst.msk [vmem:[%s893_s19 + $0x30] sm:$0xff] %vm603_vm3, %v575_v62 }
 0x1cf   : > { %v578_v63 = vpop.xlane.xlu1 %577 }
 0x1d0   : > { %611 = vst.msk [vmem:[%s893_s19 + $0x38] sm:$0xff] %vm603_vm3, %v578_v63 }
 0x1d7   : > { %v581_v0 = vpop.xlane.xlu2 %580  ;;  %v596_v1 = vpop.xlane.xlu1 %595 }
 0x1d8   : > { %612 = vst.msk [vmem:[%s893_s19 + $0x40] sm:$0xff] %vm603_vm3, %v581_v0 }
 0x1d9   : > { %617 = vst.msk [vmem:[%s893_s19 + $0x68] sm:$0xff] %vm603_vm3, %v596_v1 }
 0x1df   : > { %v599_v2 = vpop.xlane.xlu2 %598  ;;  %v584_v3 = vpop.xlane.xlu0 %583 }
 0x1e0   : > { %618 = vst.msk [vmem:[%s893_s19 + $0x70] sm:$0xff] %vm603_vm3, %v599_v2 }
 0x1e1   : > { %613 = vst.msk [vmem:[%s893_s19 + $0x48] sm:$0xff] %vm603_vm3, %v584_v3 }
 0x1e7   : > { %v602_v4 = vpop.xlane.xlu0 %601 }
 0x1e8   : > { %619 = vst.msk [vmem:[%s893_s19 + $0x78] sm:$0xff] %vm603_vm3, %v602_v4 }
 0x1e9 PF: > { %s16_s21 = sadd.s32 1, %s751_s21  }
 0x1ea   : > { %p13_p4 = scmp.ge.s32.totalorder %s16_s21, 5  }
 0x1ec   :  { %15 = sbr.rel (!%p13_p4) target bundleno = 1 (0x1), region = 77 }

</bundles_post_ra>
